<compile_context>
chip_gen: v6e
topology: v6e:2x2x1
jax: 0.10.0
libtpu: 0.0.40
codegen_flags: <defaults>
</compile_context>

<pallas_src>
import jax
import jax.numpy as jnp
from jax.experimental import pallas as pl
from jax.experimental.pallas import tpu as pltpu


# ------------------------------ Pallas kernel -------------------------------

def _spatial_attn_kernel(w_ref, b_ref, x_ref, o_ref):
    """Fused 1x1-conv(->1 ch) + folded-BN + sigmoid + x*scale.

    w_ref : VMEM (C, 1) f32   conv weight with the BN scale folded in
    b_ref : SMEM (1,)   f32   folded BN bias
    x_ref : VMEM (nb, C, T)   nb batch elements, spatial (H*W) tile on lanes
    o_ref : VMEM (nb, C, T)
    """
    # Full-width VPU multiply + one cross-sublane (XLU) reduce over channels.
    x32 = x_ref[...].astype(jnp.float32)                    # (nb, C, T)
    w = w_ref[...]                                           # (C, 1) lane-broadcast
    logit = jnp.sum(x32 * w, axis=1, keepdims=True)          # (nb, 1, T)
    attn = jax.nn.sigmoid(logit + b_ref[0])                  # (nb, 1, T)  EUP
    # Re-read x_ref for the elementwise pass so the f32 copy above need not
    # stay live across the reduce (no spills on big tiles; native-dtype VALU).
    o_ref[...] = (x_ref[...] * attn.astype(x_ref.dtype)).astype(o_ref.dtype)


# ----------------------------- block selection --------------------------------

def _largest_128_divisor_leq(hw, limit):
    """Largest divisor of hw that is a multiple of 128 and <= limit (or None)."""
    best = None
    d = 128
    top = min(hw, max(limit, 0))
    while d <= top:
        if hw % d == 0:
            best = d
        d += 128
    return best


def _choose_blocks(n, c, hw, itemsize, *, max_block_bytes=4 << 20):
    """Pick (n_blk, tile): MiB-scale blocks under a v7x-safe VMEM budget
    (pipelined footprint ~= 4 * block_bytes), with >= 2 total grid steps when
    possible so both v7x TensorCores get work."""
    # Spatial tile: largest multiple-of-128 divisor of hw under the budget.
    if hw % 128 == 0:
        tile = _largest_128_divisor_leq(hw, max_block_bytes // max(1, c * itemsize))
        if tile is None:
            tile = 128
    else:
        # TODO(synk): pad / masked tail for non-multiple-of-128 H*W; full-extent
        # block keeps this simple and correct.
        tile = hw

    # Batch block: largest divisor of n keeping the block under the budget.
    n_blk = 1
    limit = max(1, max_block_bytes // max(1, c * tile * itemsize))
    for d in range(min(n, limit), 0, -1):
        if n % d == 0:
            n_blk = d
            break

    # Keep >= 2 grid steps (v7x has 2 TensorCores sharing the chip).
    if (n // n_blk) * (hw // tile) < 2:
        if n >= 2:
            for d in range(n // 2, 0, -1):
                if n % d == 0:
                    n_blk = d
                    break
        elif hw % 256 == 0:
            t2 = _largest_128_divisor_leq(hw, hw // 2)
            if t2 is not None:
                tile = t2
    return n_blk, tile


# ----------------------------- kernel wrapper --------------------------------

def spatial_attention(x_nchw, w_eff, bias):
    """x_nchw: (N, C, H, W); w_eff: (C, 1) f32 folded weights; bias: (1,) f32."""
    n, c, h, w = x_nchw.shape
    hw = h * w
    x3d = x_nchw.reshape(n, c, hw)                         # free view, H*W on lanes
    itemsize = jnp.dtype(x_nchw.dtype).itemsize
    n_blk, tile = _choose_blocks(n, c, hw, itemsize)
    grid = (n // n_blk, hw // tile)

    out3d = pl.pallas_call(
        _spatial_attn_kernel,
        out_shape=jax.ShapeDtypeStruct((n, c, hw), x_nchw.dtype),
        grid=grid,
        in_specs=[
            pl.BlockSpec((c, 1), lambda i, j: (0, 0)),                # w_eff (VMEM)
            pl.BlockSpec(memory_space=pltpu.MemorySpace.SMEM),        # bias
            pl.BlockSpec((n_blk, c, tile), lambda i, j: (i, 0, j)),   # x
        ],
        out_specs=pl.BlockSpec((n_blk, c, tile), lambda i, j: (i, 0, j)),
        compiler_params=pltpu.CompilerParams(
            dimension_semantics=("parallel", "parallel")),
    )(w_eff, bias, x3d)
    return out3d.reshape(n, c, h, w)


# ----------------------------- parameter folding -----------------------------

def fold_bn_into_conv(w_conv, gamma, beta, mean, var, eps=1e-5):
    """Fold inference-mode BatchNorm2d(1) into the 1x1 conv.

    w_conv: (1, C, 1, 1) torch Conv2d weight layout (bias=False).
    Returns (w_eff: (C, 1), bias: (1,)) so that
        sigmoid(BN(conv(x))) == sigmoid(sum_c w_eff[c] * x[:, c] + bias).
    """
    s = gamma / jnp.sqrt(var + eps)                          # (1,)
    w_eff = (w_conv[0, :, 0, 0] * s[0]).astype(jnp.float32)  # (C,)
    bias = (beta - mean * s).astype(jnp.float32)             # (1,)
    return w_eff.reshape(-1, 1), bias


# --------------------------------- demo / test --------------------------------

if __name__ == "__main__":
    key = jax.random.PRNGKey(0)
    kx, kw, kg, kb, km, kv = jax.random.split(key, 6)

    N, C, H, W = 2, 4, 16, 16
    x = jax.random.normal(kx, (N, C, H, W), jnp.float32)

    # SpatialAttention parameters: conv weight + BatchNorm2d(1) affine/running stats
    w_conv = 0.3 * jax.random.normal(kw, (1, C, 1, 1), jnp.float32)
    gamma = 1.0 + 0.1 * jax.random.normal(kg, (1,), jnp.float32)
    beta = 0.1 * jax.random.normal(kb, (1,), jnp.float32)
    mean = 0.1 * jax.random.normal(km, (1,), jnp.float32)
    var = jax.random.uniform(kv, (1,), jnp.float32, minval=0.5, maxval=1.5)

    w_eff, bias = fold_bn_into_conv(w_conv, gamma, beta, mean, var)

    out = jax.jit(spatial_attention)(x, w_eff, bias)
    out = jax.block_until_ready(out)

    # pure-JAX reference (same inference-mode BN fold)
    logit_ref = jnp.einsum("nchw,c->nhw", x, w_conv[0, :, 0, 0])
    s = gamma / jnp.sqrt(var + 1e-5)
    attn_ref = jax.nn.sigmoid(logit_ref * s[0] + (beta - mean * s)[0])
    ref = x * attn_ref[:, None, :, :]

    assert out.shape == (N, C, H, W) and out.dtype == jnp.float32
    err = float(jnp.max(jnp.abs(out - ref)))
    assert jnp.allclose(out, ref, atol=1e-4, rtol=1e-4), f"max abs err {err}"
    print("KERNEL_OK")
</pallas_src>

<mosaic_0001>
module attributes {stable_mosaic.version = 11 : i64} {
  func.func @_spatial_attn_kernel(%arg0: i32, %arg1: i32, %arg2: memref<4x1xf32, #tpu.memory_space<vmem>>, %arg3: memref<1xf32, #tpu.memory_space<smem>>, %arg4: memref<1x4x256xf32, #tpu.memory_space<vmem>>, %arg5: memref<1x4x256xf32, #tpu.memory_space<vmem>>) attributes {dimension_semantics = [#tpu.dimension_semantics<parallel>, #tpu.dimension_semantics<parallel>], iteration_bounds = array<i64: 2, 1>, scalar_prefetch = 0 : i64, scratch_operands = 0 : i64, tpu.core_type = #tpu.core_type<tc>, window_params = [{pipeline_mode = #tpu.pipeline_mode<synchronous>, transform_indices = @transform_0, window_bounds = array<i64: 4, 1>}, {transform_indices = @transform_1, window_bounds = array<i64: 1>}, {transform_indices = @transform_2, window_bounds = array<i64: 1, 4, 256>}, {transform_indices = @transform_3, window_bounds = array<i64: 1, 4, 256>}]} {
    %c0 = arith.constant 0 : index
    %c0_0 = arith.constant 0 : index
    %c0_1 = arith.constant 0 : index
    %0 = vector.load %arg4[%c0, %c0_0, %c0_1] : memref<1x4x256xf32, #tpu.memory_space<vmem>>, vector<1x4x256xf32>
    %c0_2 = arith.constant 0 : index
    %c0_3 = arith.constant 0 : index
    %1 = vector.load %arg2[%c0_2, %c0_3] : memref<4x1xf32, #tpu.memory_space<vmem>>, vector<4x1xf32>
    %2 = vector.shape_cast %1 : vector<4x1xf32> to vector<1x4x1xf32>
    %3 = vector.broadcast %2 : vector<1x4x1xf32> to vector<1x4x256xf32>
    %4 = arith.mulf %0, %3 : vector<1x4x256xf32>
    %cst = arith.constant dense<0.000000e+00> : vector<1x256xf32>
    %5 = vector.multi_reduction <add>, %4, %cst [1] : vector<1x4x256xf32> to vector<1x256xf32>
    %6 = vector.shape_cast %5 : vector<1x256xf32> to vector<1x1x256xf32>
    %c0_4 = arith.constant 0 : index
    %7 = memref.load %arg3[%c0_4] : memref<1xf32, #tpu.memory_space<smem>>
    %8 = vector.broadcast %7 : f32 to vector<1x1x256xf32>
    %9 = arith.addf %6, %8 : vector<1x1x256xf32>
    %10 = arith.negf %9 : vector<1x1x256xf32>
    %11 = math.exp %10 : vector<1x1x256xf32>
    %cst_5 = arith.constant 1.000000e+00 : f32
    %12 = vector.broadcast %cst_5 : f32 to vector<1x1x256xf32>
    %13 = arith.addf %12, %11 : vector<1x1x256xf32>
    %14 = arith.divf %12, %13 : vector<1x1x256xf32>
    %c0_6 = arith.constant 0 : index
    %c0_7 = arith.constant 0 : index
    %c0_8 = arith.constant 0 : index
    %15 = vector.load %arg4[%c0_6, %c0_7, %c0_8] : memref<1x4x256xf32, #tpu.memory_space<vmem>>, vector<1x4x256xf32>
    %16 = vector.broadcast %14 : vector<1x1x256xf32> to vector<1x4x256xf32>
    %17 = arith.mulf %15, %16 : vector<1x4x256xf32>
    %c0_9 = arith.constant 0 : index
    %c0_10 = arith.constant 0 : index
    %c0_11 = arith.constant 0 : index
    %18 = vector.load %arg5[%c0_9, %c0_10, %c0_11] : memref<1x4x256xf32, #tpu.memory_space<vmem>>, vector<1x4x256xf32>
    tpu.vector_store %arg5[%c0_9, %c0_10, %c0_11], %17 {strides = array<i32>} : memref<1x4x256xf32, #tpu.memory_space<vmem>>, vector<1x4x256xf32>,
    return
  }
  func.func @transform_0(%arg0: i32, %arg1: i32) -> (i32, i32) {
    %c0_i32 = arith.constant 0 : i32
    %c0_i32_0 = arith.constant 0 : i32
    %c0_i32_1 = arith.constant 0 : i32
    return %c0_i32, %c0_i32_0 : i32, i32
  }
  func.func @transform_1(%arg0: i32, %arg1: i32) -> i32 {
    %c0_i32 = arith.constant 0 : i32
    %c0_i32_0 = arith.constant 0 : i32
    return %c0_i32 : i32
  }
  func.func @transform_2(%arg0: i32, %arg1: i32) -> (i32, i32, i32) {
    %c0_i32 = arith.constant 0 : i32
    %c0_i32_0 = arith.constant 0 : i32
    return %arg0, %c0_i32, %arg1 : i32, i32, i32
  }
  func.func @transform_3(%arg0: i32, %arg1: i32) -> (i32, i32, i32) {
    %c0_i32 = arith.constant 0 : i32
    %c0_i32_0 = arith.constant 0 : i32
    return %arg0, %c0_i32, %arg1 : i32, i32, i32
  }
}

</mosaic_0001>

<bundles_post_ra>
// kernel: spatial_attention.1
= control target key start
LH: loop header
LB: loop body
LE: loop exit
PB: predicated region body
PF: predicated region fallthrough
CT: control target
= control target key end

     0   :  { %s452_s14 = smov 0   ;;  %s454_s15 = smov 0   ;;  %s495_s0 = inlined_call_operand.vmem [shape: f32[4,1], index: 0, kind: input, shape index: {}]   ;;  %s496_s1 = inlined_call_operand.<no memory space> [shape: f32[1], index: 1, kind: input, shape index: {}]   ;;  %s497_s2 = inlined_call_operand.vmem [shape: f32[2,4,256], index: 2, kind: input, shape index: {}]   ;;  %s498_s3 = inlined_call_operand.vmem [shape: f32[2,4,256], index: 3, kind: output, shape index: {}]  }
   0x1   :  { %8 = sst [smem:[#allocation2]] %s496_s1  ;;  %s456_s16 = smov 0  }
   0x2 LB: > { %s26_s1 = sadd.s32 1, %s421_s15  ;;  %p357_p0 = scmp.ge.s32.totalorder %s425_s16, 1  ;;  %s425_s16 = sphi %s456_s16, %s14_s16   ;;  %s421_s15 = sphi %s454_s15, %s500_s15   ;;  %s417_s14 = sphi %s452_s14, %s499_s14  }
   0x3   : > { %p28_p1 = scmp.ge.s32.totalorder %s26_s1, 2  ;;  %p159_p2 = scmp.lt.s32.totalorder %s425_s16, 3 }
   0x5   : > { %s502_s1 = smov (%p28_p1, %s26_s1), 0  ;;  %p160_p3 = pnand %p357_p0, %p159_p2 }
   0x6   : > { %p192_p4 = scmp.lt.s32.totalorder (!%p160_p3), %s417_s14, 1  ;;  %s244_s23 = sld [smem:[#allocation2]] (!%p160_p3) }
   0x7   : > { %163 = sbr.rel (%p160_p3) target bundleno = 196 (0xc4), region = 32 }
   0xc   : > { %v212_v0 = vld [vmem:[%s495_s0] sm:$0xf]  ;;  %v427_v1 = vmov 0   ;;  %v428_v2 = vmov 839922192   ;;  %v220_v4 = vlaneseq  ;;  %s504_s14 = smov (!%p192_p4, %s417_s14), 1  ;;  %v245_v24 = vstv %s244_s23 }
   0xd   : > { %394 = vset.pattern.permute.xlu0 %v427_v1  ;;  %v218_v3 = vunpack.c.l.s4 %v428_v2  ;;  %s366_s19 = sshll.u32 %s504_s14, 3  ;;  %vm229_vm0 = vcmask 1043456  }
   0xe   : > { %215 = vperm.xlu0 %394, %v212_v0   ;;  %v221_v6 = vshrl.u32 %v220_v4, 7  ;;  %s199_s22 = scalar_lea.vmem %s497_s2, %s366_s19  ;;  %s209_s26 = scalar_lea.vmem %s498_s3, %s366_s19 }
   0xf   : > { %v219_v5 = vunpack.c.0.s8 %v218_v3  ;;  %v211_v9 = vld [vmem:[%s199_s22] sm:$0xff] }
  0x11   : > { %v222_v7 = vsub.s32 %v219_v5, %v221_v6 }
  0x89   : > { %v216_v8 = vpop.permute.xlu0 %215 }
  0x8a   : > { %v223_v10 = vrot.slane %v216_v8, %v222_v7 }
  0x8c   : > { %v225_v11 = vmul.f32 %v223_v10, %v211_v9 }
  0x8e   : > { %v227_v12 = vcombine.high %v225_v11, %v225_v11  ;;  %v230_v13 = vsel %vm229_vm0, %v225_v11, 0.0 }
  0x8f   : > { %v231_v14 = vrot.slane %v230_v13, 4 }
  0x90   : > { %v237_v15 = vsel %vm229_vm0, %v227_v12, 0.0 }
  0x91   : > { %v232_v16 = vadd.f32 %v231_v14, %v230_v13  ;;  %v238_v17 = vrot.slane %v237_v15, 4 }
  0x93   : > { %v233_v18 = vrot.slane %v232_v16, 2  ;;  %v239_v19 = vadd.f32 %v238_v17, %v237_v15 }
  0x95   : > { %v234_v20 = vadd.f32 %v233_v18, %v232_v16  ;;  %v240_v21 = vrot.slane %v239_v19, 2 }
  0x97   : > { %v235_v22 = vrot.slane %v234_v20, 1  ;;  %v241_v23 = vadd.f32 %v240_v21, %v239_v19 }
  0x99   : > { %v236_v25 = vadd.f32 %v235_v22, %v234_v20  ;;  %v242_v26 = vrot.slane %v241_v23, 1 }
  0x9b   : > { %v243_v27 = vadd.f32 %v242_v26, %v241_v23  ;;  %v246_v28 = vadd.f32 %v245_v24, %v236_v25 }
  0x9d   : > { %v247_v29 = vadd.f32 %v245_v24, %v243_v27  ;;  %v362_v30 = vmul.f32 -1.442695, %v246_v28 }
  0x9f   : > { %395 = vpow2.f32 %v362_v30  ;;  %v363_v31 = vmul.f32 -1.442695, %v247_v29 }
  0xa1   : > { %397 = vpow2.f32 %v363_v31 }
  0xac   : > { %v396_v32 = vpop.eup %395 }
  0xad   : > { %v254_v33 = vadd.f32 1.0, %v396_v32 }
  0xae   : > { %v398_v34 = vpop.eup %397 }
  0xaf   : > { %v255_v35 = vadd.f32 1.0, %v398_v34  ;;  %399 = vrcp.f32 %v254_v33 }
  0xb1   : > { %401 = vrcp.f32 %v255_v35 }
  0xbc   : > { %v400_v36 = vpop.eup %399 }
  0xbe   : > { %v402_v37 = vpop.eup %401 }
  0xbf   : > { %v262_v38 = vcombine.low %v400_v36, %v402_v37 }
  0xc1   : > { %v264_v39 = vmul.f32 %v262_v38, %v211_v9 }
  0xc3   : > { %265 = vst [vmem:[%s209_s26] sm:$0xff] %v264_v39 }
  0xc4 PF: > { %s14_s16 = sadd.s32 1, %s425_s16   ;;  %s499_s14 = smov %s421_s15 }
  0xc5   : > { %p11_p5 = scmp.ge.s32.totalorder %s14_s16, 4   ;;  %s500_s15 = smov %s502_s1 }
  0xc7   :  { %13 = sbr.rel (!%p11_p5) target bundleno = 2 (0x2), region = 62 }

</bundles_post_ra>
